<compile_context>
chip_gen: v5e
topology: v5e:2x2
jax: 0.10.0
libtpu: 0.0.40
codegen_flags: <defaults>
</compile_context>

<pallas_src>
import jax
import jax.numpy as jnp
from jax.experimental import pallas as pl
from jax.experimental.pallas import tpu as pltpu


# ----------------------------- Pallas kernels ---------------------------------
# Data layout inside every kernel: (N, d+1, a, B_tile)
#   - B_tile on lanes (>=128 when possible), a on sublanes, (N, d+1) leading.
#   - group sums over the d+1 axis are leading-dim vreg adds (pure VPU, no XLU).
# Coefficients: (N, d+1, a, 1) f32, resident across grid steps (constant index_map).

_COMPILER_PARAMS = pltpu.CompilerParams(dimension_semantics=("parallel",))


def _minv_lane_kernel(csum_ref, cdiag_ref, p_ref, v_ref):
    # v[g,j] = inv_mass[g] * sum_j' p[g,j'] + padded_inv_inertia[g,j] * p[g,j]
    p = p_ref[...].astype(jnp.float32)                  # (N, d+1, a, Bt)
    gsum = jnp.sum(p, axis=1, keepdims=True)            # leading-axis vreg adds
    v = gsum * csum_ref[...] + p * cdiag_ref[...]       # VPU, lane-broadcast coeffs
    v_ref[...] = v.astype(v_ref.dtype)


def _m_lane_kernel(ipad_ref, mass_ref, is0_ref, v_ref, out_ref):
    # row 0:  m0*v0 + sum_i I_i*(v0 - v_i);   row i:  I_i*(v_i - v0)
    v = v_ref[...].astype(jnp.float32)                  # (N, d+1, a, Bt)
    v0 = v[:, :1]                                       # (N, 1, a, Bt)
    idv = ipad_ref[...] * (v - v0)                      # zero on row 0
    s = jnp.sum(idv, axis=1, keepdims=True)             # (N, 1, a, Bt)
    out = idv + is0_ref[...] * (mass_ref[...] * v0 - s)
    out_ref[...] = out.astype(out_ref.dtype)


def _kinetic_lane_kernel(csum_ref, cdiag_ref, p_ref, t_ref):
    # Fused 0.5 * sum_{g,j,a} p * Minv(p); the 0.5 is folded into csum/cdiag.
    p = p_ref[...].astype(jnp.float32)                  # (N, d+1, a, Bt)
    gsum = jnp.sum(p, axis=1, keepdims=True)
    hv = gsum * csum_ref[...] + p * cdiag_ref[...]      # 0.5 * Minv(p)
    t = jnp.sum(p * hv, axis=(0, 1))                    # leading-dim vreg adds -> (a, Bt)
    t_ref[...] = jnp.sum(t, axis=0, keepdims=True)      # single sublane reduce -> (1, Bt)


# ----------------------------- pallas_call plumbing ----------------------------


def _pick_lane_tile(B):
    # biggest "nice" lane tile that exactly divides B; small/odd B -> single full block
    for t in (1024, 512, 256, 128):
        if B % t == 0:
            return t
    return B


def _coeff_spec(N, d1, a):
    # tiny resident coefficient tile (constant index_map -> stays in VMEM across steps)
    return pl.BlockSpec((N, d1, a, 1), lambda i: (0, 0, 0, 0))


def _data_spec(N, d1, a, tile):
    return pl.BlockSpec((N, d1, a, tile), lambda i: (0, 0, 0, i))


def _minv_lane_call(csum, cdiag, p_lane):
    N, d1, a, B = p_lane.shape
    tile = _pick_lane_tile(B)
    return pl.pallas_call(
        _minv_lane_kernel,
        grid=(B // tile,),
        out_shape=jax.ShapeDtypeStruct((N, d1, a, B), p_lane.dtype),
        in_specs=[_coeff_spec(N, d1, a), _coeff_spec(N, d1, a), _data_spec(N, d1, a, tile)],
        out_specs=_data_spec(N, d1, a, tile),
        compiler_params=_COMPILER_PARAMS,
    )(csum, cdiag, p_lane)


def _m_lane_call(ipad, mass, is0, v_lane):
    N, d1, a, B = v_lane.shape
    tile = _pick_lane_tile(B)
    return pl.pallas_call(
        _m_lane_kernel,
        grid=(B // tile,),
        out_shape=jax.ShapeDtypeStruct((N, d1, a, B), v_lane.dtype),
        in_specs=[_coeff_spec(N, d1, a)] * 3 + [_data_spec(N, d1, a, tile)],
        out_specs=_data_spec(N, d1, a, tile),
        compiler_params=_COMPILER_PARAMS,
    )(ipad, mass, is0, v_lane)


def _kinetic_lane_call(csum, cdiag, p_lane):
    N, d1, a, B = p_lane.shape
    tile = _pick_lane_tile(B)
    return pl.pallas_call(
        _kinetic_lane_kernel,
        grid=(B // tile,),
        out_shape=jax.ShapeDtypeStruct((1, B), jnp.float32),
        in_specs=[_coeff_spec(N, d1, a), _coeff_spec(N, d1, a), _data_spec(N, d1, a, tile)],
        out_specs=pl.BlockSpec((1, tile), lambda i: (0, i)),   # lane-dense kinetic output
        compiler_params=_COMPILER_PARAMS,
    )(csum, cdiag, p_lane)


# ----------------------------- coefficient builders ----------------------------
# exp of ~N*(d+1) numbers, pre-broadcast over the `a` axis; fused under jit.


def _minv_coeffs(d_moments, a, scale=1.0):
    N, d1 = d_moments.shape
    inv_m = scale * jnp.exp(-d_moments.astype(jnp.float32))
    c_sum = jnp.broadcast_to(inv_m[:, :1], (N, d1))
    c_diag = jnp.concatenate([jnp.zeros((N, 1), jnp.float32), inv_m[:, 1:]], axis=1)
    bcast = lambda c: jnp.broadcast_to(c[:, :, None, None], (N, d1, a, 1))
    return bcast(c_sum), bcast(c_diag)


def _m_coeffs(d_moments, a):
    N, d1 = d_moments.shape
    m = jnp.exp(d_moments.astype(jnp.float32))
    i_pad = jnp.concatenate([jnp.zeros((N, 1), jnp.float32), m[:, 1:]], axis=1)
    mass = jnp.broadcast_to(m[:, :1], (N, d1))
    is0 = jnp.concatenate(
        [jnp.ones((N, 1), jnp.float32), jnp.zeros((N, d1 - 1), jnp.float32)], axis=1)
    bcast = lambda c: jnp.broadcast_to(c[:, :, None, None], (N, d1, a, 1))
    return bcast(i_pad), bcast(mass), bcast(is0)


# ----------------------------- jitted wrappers ---------------------------------
# Lane-native entry points (no transposes): use these if the integrator keeps its
# state in the (N, d+1, a, B) layout.


@jax.jit
def minv_lane(d_moments, p_lane):
    return _minv_lane_call(*_minv_coeffs(d_moments, p_lane.shape[2]), p_lane)


@jax.jit
def m_lane(d_moments, v_lane):
    return _m_lane_call(*_m_coeffs(d_moments, v_lane.shape[2]), v_lane)


@jax.jit
def kinetic_lane(d_moments, p_lane):
    t = _kinetic_lane_call(*_minv_coeffs(d_moments, p_lane.shape[2], scale=0.5), p_lane)
    return t.reshape(p_lane.shape[3])


# Torch-layout API wrappers: one relayout copy in / one out (layout plumbing).


@jax.jit
def minv_pallas(d_moments, p):
    """p: (B, n_dof, dof_ndim) -> Minv(p), same shape."""
    N, d1 = d_moments.shape
    B, n, a = p.shape
    csum, cdiag = _minv_coeffs(d_moments, a)
    p_lane = jnp.transpose(p.reshape(B, N, d1, a), (1, 2, 3, 0))   # batch -> lane axis
    v_lane = _minv_lane_call(csum, cdiag, p_lane)
    return jnp.transpose(v_lane, (3, 0, 1, 2)).reshape(B, n, a)


@jax.jit
def m_pallas(d_moments, v):
    """v: (B, n_dof, dof_ndim) -> M(v), same shape."""
    N, d1 = d_moments.shape
    B, n, a = v.shape
    ipad, mass, is0 = _m_coeffs(d_moments, a)
    v_lane = jnp.transpose(v.reshape(B, N, d1, a), (1, 2, 3, 0))
    out_lane = _m_lane_call(ipad, mass, is0, v_lane)
    return jnp.transpose(out_lane, (3, 0, 1, 2)).reshape(B, n, a)


@jax.jit
def hamiltonian_kinetic_pallas(d_moments, z):
    """z: (B, 2*n_dof*dof_ndim) -> kinetic term T (B,), one fused pallas_call."""
    N, d1 = d_moments.shape
    n = N * d1
    B, zdim = z.shape
    a = zdim // (2 * n)
    csum, cdiag = _minv_coeffs(d_moments, a, scale=0.5)   # fold the 0.5 into the coeffs
    # The momentum-half slice fuses into the single lane-major relayout copy under jit,
    # so p is never materialized in batch-major layout.
    p_lane = jnp.transpose(z.reshape(B, 2, N, d1, a)[:, 1], (1, 2, 3, 0))
    t = _kinetic_lane_call(csum, cdiag, p_lane)            # (1, B) lane-dense
    return t.reshape(B)


# ----------------------------- pure-JAX references (PyTorch semantics) ---------
# Also used as the tiny-batch fallback (custom-call overhead dominates below ~128 lanes).


def minv_reference(d_moments, p, d):
    B, n, a = p.shape
    N = n // (d + 1)
    p_r = p.reshape(B, N, d + 1, a)
    inv_moments = jnp.exp(-d_moments)
    inv_masses = inv_moments[:, :1]
    if d == 0:
        return (inv_masses[..., None] * p_r).reshape(B, n, a)
    padded = jnp.concatenate([0.0 * inv_masses, inv_moments[:, 1:]], axis=-1)
    inverse_massed_p = p_r.sum(-2, keepdims=True) * inv_masses[:, :, None]
    total = inverse_massed_p + p_r * padded[:, :, None]
    return total.reshape(B, n, a)


def m_reference(d_moments, v, d):
    B, n, a = v.shape
    N = n // (d + 1)
    v_r = v.reshape(B, N, d + 1, a)
    moments = jnp.exp(d_moments)
    masses = moments[:, :1]
    if d == 0:
        return (masses[..., None] * v_r).reshape(B, n, a)
    a00 = (masses + moments[:, 1:].sum(-1, keepdims=True))[..., None]
    a0i = -moments[:, 1:, None]
    p0 = a00 * v_r[..., :1, :] + (a0i * v_r[..., 1:, :]).sum(-2, keepdims=True)
    aii = moments[:, 1:, None]
    pi = a0i * v_r[..., :1, :] + aii * v_r[..., 1:, :]
    return jnp.concatenate([p0, pi], axis=-2).reshape(B, n, a)


# ----------------------------- CH module port ---------------------------------


class CHPallas:
    """JAX/Pallas port of the compute core of biases.models.constrained_hnn.CH."""

    def __init__(self, n_dof, dof_ndim, d, key, pallas_min_batch=128):
        self.n_dof = n_dof
        self.dof_ndim = dof_ndim
        self.d = d
        self.q_ndim = n_dof * dof_ndim
        self.pallas_min_batch = pallas_min_batch
        assert n_dof % (d + 1) == 0
        N = n_dof // (d + 1)
        # same init as torch: 0.1 * randn(N, d+1), deterministic via PRNGKey
        self.d_moments = 0.1 * jax.random.normal(key, (N, d + 1), dtype=jnp.float32)

    def Minv(self, p):
        if p.shape[0] < self.pallas_min_batch:        # tiny-problem fallback (pure jnp)
            return minv_reference(self.d_moments, p, self.d)
        return minv_pallas(self.d_moments, p)

    def M(self, v):
        if v.shape[0] < self.pallas_min_batch:
            return m_reference(self.d_moments, v, self.d)
        return m_pallas(self.d_moments, v)

    def H(self, t, z):
        """Hamiltonian. z: (B, 2*n_dof*dof_ndim). Returns the kinetic term T (size B).
        (V == compute_V is NotImplementedError in the CH base class.)"""
        assert z.shape[-1] == 2 * self.q_ndim
        if z.shape[0] < self.pallas_min_batch:
            B = z.shape[0]
            p = z[:, self.q_ndim:].reshape(B, self.n_dof, self.dof_ndim)
            v = minv_reference(self.d_moments, p, self.d)
            return 0.5 * jnp.sum(p * v, axis=(-2, -1))
        return hamiltonian_kinetic_pallas(self.d_moments, z)

    def forward(self, t, z):
        # TODO(synk): ConstrainedHamiltonianDynamics (constraint-projected symplectic
        # gradient of H) requires rigid_DPhi(G) which is not available in-script.
        raise NotImplementedError


# ----------------------------- demo / self-check -------------------------------


if __name__ == "__main__":
    key = jax.random.PRNGKey(0)
    k_param, k_z, k_v, k_z2 = jax.random.split(key, 4)

    dof_ndim = 3    # Cartesian dimension a
    d = 2           # rigid bodies made of (d+1)=3 point masses
    n_dof = 6       # two rigid bodies -> N = 2 groups
    q_ndim = n_dof * dof_ndim
    B = 256         # batch on the lane axis (2 x 128 lanes, single 256-wide tile)

    model = CHPallas(n_dof=n_dof, dof_ndim=dof_ndim, d=d, key=k_param)

    z = jax.random.normal(k_z, (B, 2 * q_ndim), dtype=jnp.float32)
    p = z[:, q_ndim:].reshape(B, n_dof, dof_ndim)
    v_in = jax.random.normal(k_v, (B, n_dof, dof_ndim), dtype=jnp.float32)

    v = jax.block_until_ready(model.Minv(p))
    T = jax.block_until_ready(model.H(0.0, z))
    mv = jax.block_until_ready(model.M(v_in))

    v_ref = minv_reference(model.d_moments, p, d)
    T_ref = 0.5 * jnp.sum(p * v_ref, axis=(-2, -1))
    mv_ref = m_reference(model.d_moments, v_in, d)

    assert v.shape == p.shape and T.shape == (B,) and mv.shape == v_in.shape
    assert jnp.allclose(v, v_ref, rtol=1e-5, atol=1e-5), "Minv mismatch"
    assert jnp.allclose(T, T_ref, rtol=1e-4, atol=1e-4), "Hamiltonian kinetic term mismatch"
    assert jnp.allclose(mv, mv_ref, rtol=1e-5, atol=1e-5), "M mismatch"

    # Multi-tile grid path: B2=384 -> 3 lane tiles of 128, "parallel" grid axis.
    B2 = 384
    z2 = jax.random.normal(k_z2, (B2, 2 * q_ndim), dtype=jnp.float32)
    p2 = z2[:, q_ndim:].reshape(B2, n_dof, dof_ndim)
    v2 = jax.block_until_ready(minv_pallas(model.d_moments, p2))
    mv2 = jax.block_until_ready(m_pallas(model.d_moments, p2))
    T2 = jax.block_until_ready(hamiltonian_kinetic_pallas(model.d_moments, z2))
    v2_ref = minv_reference(model.d_moments, p2, d)
    T2_ref = 0.5 * jnp.sum(p2 * v2_ref, axis=(-2, -1))
    mv2_ref = m_reference(model.d_moments, p2, d)
    assert jnp.allclose(v2, v2_ref, rtol=1e-5, atol=1e-5), "Minv mismatch (multi-tile)"
    assert jnp.allclose(T2, T2_ref, rtol=1e-4, atol=1e-4), "kinetic mismatch (multi-tile)"
    assert jnp.allclose(mv2, mv2_ref, rtol=1e-5, atol=1e-5), "M mismatch (multi-tile)"

    print("KERNEL_OK")
</pallas_src>

<mosaic_0001>
module attributes {stable_mosaic.version = 11 : i64} {
  func.func @_minv_lane_kernel(%arg0: i32, %arg1: memref<2x3x3x1xf32, #tpu.memory_space<vmem>>, %arg2: memref<2x3x3x1xf32, #tpu.memory_space<vmem>>, %arg3: memref<2x3x3x256xf32, #tpu.memory_space<vmem>>, %arg4: memref<2x3x3x256xf32, #tpu.memory_space<vmem>>) attributes {dimension_semantics = [#tpu.dimension_semantics<parallel>], iteration_bounds = array<i64: 1>, scalar_prefetch = 0 : i64, scratch_operands = 0 : i64, tpu.core_type = #tpu.core_type<tc>, window_params = [{pipeline_mode = #tpu.pipeline_mode<synchronous>, transform_indices = @transform_0, window_bounds = array<i64: 2, 3, 3, 1>}, {pipeline_mode = #tpu.pipeline_mode<synchronous>, transform_indices = @transform_1, window_bounds = array<i64: 2, 3, 3, 1>}, {transform_indices = @transform_2, window_bounds = array<i64: 2, 3, 3, 256>}, {transform_indices = @transform_3, window_bounds = array<i64: 2, 3, 3, 256>}]} {
    %c0 = arith.constant 0 : index
    %c0_0 = arith.constant 0 : index
    %c0_1 = arith.constant 0 : index
    %c0_2 = arith.constant 0 : index
    %0 = vector.load %arg3[%c0, %c0_0, %c0_1, %c0_2] : memref<2x3x3x256xf32, #tpu.memory_space<vmem>>, vector<2x3x3x256xf32>
    %cst = arith.constant dense<0.000000e+00> : vector<2x3x256xf32>
    %1 = vector.multi_reduction <add>, %0, %cst [1] : vector<2x3x3x256xf32> to vector<2x3x256xf32>
    %2 = vector.shape_cast %1 : vector<2x3x256xf32> to vector<2x1x3x256xf32>
    %c0_3 = arith.constant 0 : index
    %c0_4 = arith.constant 0 : index
    %c0_5 = arith.constant 0 : index
    %c0_6 = arith.constant 0 : index
    %3 = vector.load %arg1[%c0_3, %c0_4, %c0_5, %c0_6] : memref<2x3x3x1xf32, #tpu.memory_space<vmem>>, vector<2x3x3x1xf32>
    %4 = vector.broadcast %2 : vector<2x1x3x256xf32> to vector<2x3x3x256xf32>
    %5 = vector.broadcast %3 : vector<2x3x3x1xf32> to vector<2x3x3x256xf32>
    %6 = arith.mulf %4, %5 : vector<2x3x3x256xf32>
    %c0_7 = arith.constant 0 : index
    %c0_8 = arith.constant 0 : index
    %c0_9 = arith.constant 0 : index
    %c0_10 = arith.constant 0 : index
    %7 = vector.load %arg2[%c0_7, %c0_8, %c0_9, %c0_10] : memref<2x3x3x1xf32, #tpu.memory_space<vmem>>, vector<2x3x3x1xf32>
    %8 = vector.broadcast %7 : vector<2x3x3x1xf32> to vector<2x3x3x256xf32>
    %9 = arith.mulf %0, %8 : vector<2x3x3x256xf32>
    %10 = arith.addf %6, %9 : vector<2x3x3x256xf32>
    %c0_11 = arith.constant 0 : index
    %c0_12 = arith.constant 0 : index
    %c0_13 = arith.constant 0 : index
    %c0_14 = arith.constant 0 : index
    %11 = vector.load %arg4[%c0_11, %c0_12, %c0_13, %c0_14] : memref<2x3x3x256xf32, #tpu.memory_space<vmem>>, vector<2x3x3x256xf32>
    tpu.vector_store %arg4[%c0_11, %c0_12, %c0_13, %c0_14], %10 {strides = array<i32>} : memref<2x3x3x256xf32, #tpu.memory_space<vmem>>, vector<2x3x3x256xf32>,
    return
  }
  func.func @transform_0(%arg0: i32) -> (i32, i32, i32, i32) {
    %c0_i32 = arith.constant 0 : i32
    %c0_i32_0 = arith.constant 0 : i32
    %c0_i32_1 = arith.constant 0 : i32
    %c0_i32_2 = arith.constant 0 : i32
    %c0_i32_3 = arith.constant 0 : i32
    return %c0_i32, %c0_i32_0, %c0_i32_1, %c0_i32_2 : i32, i32, i32, i32
  }
  func.func @transform_1(%arg0: i32) -> (i32, i32, i32, i32) {
    %c0_i32 = arith.constant 0 : i32
    %c0_i32_0 = arith.constant 0 : i32
    %c0_i32_1 = arith.constant 0 : i32
    %c0_i32_2 = arith.constant 0 : i32
    %c0_i32_3 = arith.constant 0 : i32
    return %c0_i32, %c0_i32_0, %c0_i32_1, %c0_i32_2 : i32, i32, i32, i32
  }
  func.func @transform_2(%arg0: i32) -> (i32, i32, i32, i32) {
    %c0_i32 = arith.constant 0 : i32
    %c0_i32_0 = arith.constant 0 : i32
    %c0_i32_1 = arith.constant 0 : i32
    %c0_i32_2 = arith.constant 0 : i32
    return %c0_i32, %c0_i32_0, %c0_i32_1, %arg0 : i32, i32, i32, i32
  }
  func.func @transform_3(%arg0: i32) -> (i32, i32, i32, i32) {
    %c0_i32 = arith.constant 0 : i32
    %c0_i32_0 = arith.constant 0 : i32
    %c0_i32_1 = arith.constant 0 : i32
    %c0_i32_2 = arith.constant 0 : i32
    return %c0_i32, %c0_i32_0, %c0_i32_1, %arg0 : i32, i32, i32, i32
  }
}

</mosaic_0001>

<bundles_post_ra>
// kernel: minv_pallas.1
= control target key start
LH: loop header
LB: loop body
LE: loop exit
PB: predicated region body
PF: predicated region fallthrough
CT: control target
= control target key end

     0   :  { %v335_v2 = vmov 0   ;;  %s454_s0 = inlined_call_operand.vmem [shape: f32[2,3,3,1], index: 0, kind: input, shape index: {}]   ;;  %s455_s1 = inlined_call_operand.vmem [shape: f32[2,3,3,1], index: 1, kind: input, shape index: {}]   ;;  %s456_s2 = inlined_call_operand.vmem [shape: f32[2,3,3,256], index: 2, kind: input, shape index: {}]   ;;  %s457_s3 = inlined_call_operand.hbm [shape: f32[2,3,3,256], index: 3, kind: output, shape index: {}]  }
   0x1   :  { %v129_v0 = vld [vmem:[%s455_s1] sm:$0x7]  ;;  %307 = vset.pattern.permute.xlu1 %v335_v2  ;;  %306 = vset.pattern.permute.xlu0 %v335_v2  ;;  %v131_v3 = vld [vmem:[%s455_s1 + $0x8] sm:$0x7] }
   0x2   :  { %v81_v1 = vld [vmem:[%s454_s0] sm:$0x7]  ;;  %137 = vperm.xlu1 %307, %v129_v0   ;;  %308 = vset.pattern.permute.xlu2 %v335_v2 }
   0x3   :  { %89 = vperm.xlu0 %306, %v81_v1   ;;  %145 = vperm.xlu2 %308, %v131_v3  }
   0x4   :  { %8 = vsyncpa [#allocation3], 0  ;;  %v130_v4 = vld [vmem:[%s455_s1 + $0x4] sm:$0x7]  ;;  %v132_v6 = vld [vmem:[%s455_s1 + $0xc] sm:$0x7] }
   0x5   :  { %v82_v5 = vld [vmem:[%s454_s0 + $0x4] sm:$0x7]  ;;  %v134_v7 = vld [vmem:[%s455_s1 + $0x14] sm:$0x7]  ;;  %v133_v8 = vld [vmem:[%s455_s1 + $0x10] sm:$0x7] }
   0x6   :  { %v83_v9 = vld [vmem:[%s454_s0 + $0x8] sm:$0x7]  ;;  %v85_v10 = vld [vmem:[%s454_s0 + $0x10] sm:$0x7]  ;;  %v84_v11 = vld [vmem:[%s454_s0 + $0xc] sm:$0x7] }
   0x7   :  { %v86_v12 = vld [vmem:[%s454_s0 + $0x14] sm:$0x7]  ;;  %v15_v14 = vld [vmem:[%s456_s2] sm:$0x77]  ;;  %v16_v15 = vld [vmem:[%s456_s2 + $0x8] sm:$0x77] }
   0x8   :  { %v17_v13 = vld [vmem:[%s456_s2 + $0x10] sm:$0x77]  ;;  %27 = vst [vmem:[#allocation1] ss:$2 sm:$0xff] %v15_v14  ;;  %v18_v16 = vld [vmem:[%s456_s2 + $0x18] sm:$0x77] }
   0x9   :  { %35 = vst [vmem:[#allocation1 + $0x20] ss:$2 sm:$0xff] %v17_v13  ;;  %v411_v17 = vld [vmem:[%s456_s2 + $0x20] sm:$0x77]  ;;  %v416_v20 = vld [vmem:[%s456_s2 + $0x28] sm:$0x77] }
   0xa   :  { %141 = vperm.xlu1 %307, %v130_v4   ;;  %31 = vst [vmem:[#allocation1 + $0x10] ss:$2 sm:$0xff] %v16_v15  ;;  %v336_v23 = vmov 839922192   ;;  %vm60_vm0 = vcmask 1042432   ;;  %vm264_vm1 = vcmask 1043456  }
   0xb   :  { %94 = vperm.xlu0 %306, %v82_v5   ;;  %149 = vperm.xlu2 %308, %v132_v6   ;;  %39 = vst [vmem:[#allocation1 + $0x30] ss:$2 sm:$0xff] %v18_v16  ;;  %v160_v24 = vunpack.c.l.s4 %v336_v23  ;;  %s337_s2 = smov [#allocation2]   ;;  %s289_s22 = sshll.u32 %s457_s3, 4  ;;  %s290_s22 = int_to_ptr.hbm [resolvable:$true] %s289_s22 }
   0xc   :  { %s445_s19 = sshll.u32 %s337_s2, 4  ;;  %s338_s3 = smov 128   ;;  %s288_s19 = int_to_ptr.vmem [resolvable:$true] %s445_s19 }
   0xd   :  { %v420_v25 = vunpack.c.0.s8 %v160_v24  ;;  %s339_s23 = smov 8  }
   0xf   :  { %v28_v18 = vld.sshfl [vmem:[#allocation1] sm:$0xff pattern:$0x75316420]  ;;  %v29_v19 = vld.sshfl [vmem:[#allocation1 + $0x8] sm:$0xff pattern:$0x75316420] }
  0x10   :  { %42 = vst [vmem:[#allocation1] ss:$2 sm:$0xff] %v411_v17  ;;  %v36_v28 = vld.sshfl [vmem:[#allocation1 + $0x20] sm:$0xff pattern:$0x75316420]  ;;  %v66_v31 = vsel %vm60_vm0, %v29_v19, 0.0 }
  0x11   :  { %v32_v21 = vld.sshfl [vmem:[#allocation1 + $0x10] sm:$0xff pattern:$0x75316420]  ;;  %v33_v22 = vld.sshfl [vmem:[#allocation1 + $0x18] sm:$0xff pattern:$0x75316420] }
  0x12   :  { %157 = vperm.xlu1 %307, %v134_v7   ;;  %45 = vst [vmem:[#allocation1 + $0x10] ss:$2 sm:$0xff] %v416_v20  ;;  %v37_v29 = vld.sshfl [vmem:[#allocation1 + $0x28] sm:$0xff pattern:$0x75316420]  ;;  %v67_v32 = vsel %vm60_vm0, %v33_v22, 0.0 }
  0x13   :  { %153 = vperm.xlu0 %306, %v133_v8   ;;  %99 = vperm.xlu2 %308, %v83_v9   ;;  %v61_v34 = vsel %vm60_vm0, %v28_v18, 0.0  ;;  %v62_v35 = vsel %vm60_vm0, %v32_v21, 0.0  ;;  %v68_v37 = vadd.f32 %v67_v32, %v66_v31  ;;  %v69_v38 = vsel %vm60_vm0, %v37_v29, 0.0  ;;  %v40_v39 = vld.sshfl [vmem:[#allocation1 + $0x30] sm:$0xff pattern:$0x75316420] }
  0x14   :  { %v63_v41 = vadd.f32 %v62_v35, %v61_v34  ;;  %v41_v42 = vld.sshfl [vmem:[#allocation1 + $0x38] sm:$0xff pattern:$0x75316420]  ;;  %v64_v43 = vsel %vm60_vm0, %v36_v28, 0.0 }
  0x15   :  { %v70_v44 = vadd.f32 %v69_v38, %v68_v37 }
  0x16   :  { %v65_v45 = vadd.f32 %v64_v43, %v63_v41 }
  0x17   :  { %v43_v59 = vld.sshfl [vmem:[#allocation1] sm:$0xff pattern:$0x75316420]  ;;  %v44_v60 = vld.sshfl [vmem:[#allocation1 + $0x8] sm:$0xff pattern:$0x75316420] }
  0x18   :  { %v72_v18 = vsel %vm60_vm0, %v43_v59, 0.0 }
  0x19   :  { %v46_v1 = vld.sshfl [vmem:[#allocation1 + $0x10] sm:$0xff pattern:$0x75316420]  ;;  %v47_v2 = vld.sshfl [vmem:[#allocation1 + $0x18] sm:$0xff pattern:$0x75316420] }
  0x1a   :  { %109 = vperm.xlu1 %307, %v85_v10   ;;  %v71_v10 = vsel %vm60_vm0, %v40_v39, 0.0  ;;  %v79_v21 = vsel %vm60_vm0, %v47_v2, 0.0 }
  0x1b   :  { %104 = vperm.xlu0 %306, %v84_v11   ;;  %114 = vperm.xlu2 %308, %v86_v12   ;;  %v76_v11 = vsel %vm60_vm0, %v41_v42, 0.0  ;;  %v77_v12 = vsel %vm60_vm0, %v44_v60, 0.0 }
  0x1c   :  { %v78_v22 = vadd.f32 %v77_v12, %v76_v11 }
  0x5d   :  { %v146_v26 = vpop.permute.xlu2 %145 }
  0x5e   :  { %v170_v27 = vperm.slane %v146_v26, %v420_v25 }
  0x60   :  { %v191_v30 = vmul.f32 %v170_v27, %v17_v13  ;;  %v73_v27 = vadd.f32 %v72_v18, %v71_v10 }
  0x62   :  { %209 = vst [vmem:[#allocation1 + $0x20] ss:$2 sm:$0xff] %v191_v30  ;;  %v74_v30 = vsel %vm60_vm0, %v46_v1, 0.0 }
  0x65   :  { %v150_v33 = vpop.permute.xlu2 %149 }
  0x66   :  { %v174_v36 = vperm.slane %v150_v33, %v420_v25  ;;  %v80_v33 = vadd.f32 %v79_v21, %v78_v22 }
  0x68   :  { %v192_v40 = vmul.f32 %v174_v36, %v18_v16  ;;  %v75_v36 = vadd.f32 %v74_v30, %v73_v27 }
  0x69   :  { %v210_v47 = vld.sshfl [vmem:[#allocation1 + $0x20] sm:$0xff pattern:$0x75316420]  ;;  %v211_v48 = vld.sshfl [vmem:[#allocation1 + $0x28] sm:$0xff pattern:$0x75316420] }
  0x6a   :  { %213 = vst [vmem:[#allocation1 + $0x30] ss:$2 sm:$0xff] %v192_v40 }
  0x6d   :  { %v100_v46 = vpop.permute.xlu2 %99 }
  0x6e   :  { %v121_v49 = vmul.f32 %v100_v46, %v65_v45  ;;  %v122_v50 = vmul.f32 %v100_v46, %v70_v44 }
  0x70   :  { %v238_v51 = vadd.f32 %v210_v47, %v121_v49  ;;  %v239_v52 = vadd.f32 %v211_v48, %v122_v50 }
  0x71   :  { %v214_v41 = vld.sshfl [vmem:[#allocation1 + $0x30] sm:$0xff pattern:$0x75316420]  ;;  %v215_v42 = vld.sshfl [vmem:[#allocation1 + $0x38] sm:$0xff pattern:$0x75316420] }
  0x72   :  { %v260_v53 = vrot.slane %v239_v52, 4 }
  0x74   :  { %v138_v54 = vpop.permute.xlu1 %137  ;;  %v267_v56 = vsel %vm264_vm1, %v238_v51, %v260_v53 }
  0x75   :  { %v90_v55 = vpop.permute.xlu0 %89  ;;  %v162_v57 = vperm.slane %v138_v54, %v420_v25  ;;  %279 = vst [vmem:[#allocation2 + $0x10] sm:$0x77] %v267_v56  ;;  %v115_v35 = vpop.permute.xlu2 %114 }
  0x76   :  { %v118_v0 = vmul.f32 %v90_v55, %v70_v44  ;;  %v117_v6 = vmul.f32 %v90_v55, %v65_v45  ;;  %v128_v40 = vmul.f32 %v115_v35, %v80_v33  ;;  %v127_v47 = vmul.f32 %v115_v35, %v75_v36 }
  0x77   :  { %v189_v58 = vmul.f32 %v162_v57, %v15_v14 }
  0x79   :  { %201 = vst [vmem:[#allocation1] ss:$2 sm:$0xff] %v189_v58 }
  0x7c   :  { %v142_v61 = vpop.permute.xlu1 %141 }
  0x7d   :  { %v95_v62 = vpop.permute.xlu0 %94  ;;  %v166_v63 = vperm.slane %v142_v61, %v420_v25 }
  0x7e   :  { %v120_v23 = vmul.f32 %v95_v62, %v70_v44  ;;  %v119_v31 = vmul.f32 %v95_v62, %v65_v45 }
  0x7f   :  { %v190_v3 = vmul.f32 %v166_v63, %v16_v15 }
  0x80   :  { %v202_v4 = vld.sshfl [vmem:[#allocation1] sm:$0xff pattern:$0x75316420]  ;;  %v203_v5 = vld.sshfl [vmem:[#allocation1 + $0x8] sm:$0xff pattern:$0x75316420] }
  0x81   :  { %v235_v7 = vadd.f32 %v203_v5, %v118_v0  ;;  %205 = vst [vmem:[#allocation1 + $0x10] ss:$2 sm:$0xff] %v190_v3  ;;  %v234_v8 = vadd.f32 %v202_v4, %v117_v6 }
  0x83   :  { %v258_v9 = vrot.slane %v235_v7, 4 }
  0x84   :  { %v158_v13 = vpop.permute.xlu1 %157 }
  0x85   :  { %v154_v14 = vpop.permute.xlu0 %153  ;;  %v265_v16 = vsel %vm264_vm1, %v234_v8, %v258_v9  ;;  %v182_v15 = vperm.slane %v158_v13, %v420_v25 }
  0x86   :  { %v178_v19 = vperm.slane %v154_v14, %v420_v25  ;;  %277 = vst [vmem:[#allocation2] sm:$0x77] %v265_v16 }
  0x87   :  { %v194_v24 = vmul.f32 %v182_v15, %v416_v20 }
  0x88   :  { %v193_v26 = vmul.f32 %v178_v19, %v411_v17  ;;  %v206_v28 = vld.sshfl [vmem:[#allocation1 + $0x10] sm:$0xff pattern:$0x75316420]  ;;  %v207_v29 = vld.sshfl [vmem:[#allocation1 + $0x18] sm:$0xff pattern:$0x75316420] }
  0x89   :  { %v237_v32 = vadd.f32 %v207_v29, %v120_v23  ;;  %219 = vst [vmem:[#allocation1 + $0x10] ss:$2 sm:$0xff] %v194_v24  ;;  %v236_v25 = vadd.f32 %v206_v28, %v119_v31 }
  0x8a   :  { %216 = vst [vmem:[#allocation1] ss:$2 sm:$0xff] %v193_v26 }
  0x8b   :  { %v259_v34 = vrot.slane %v237_v32, 4 }
  0x8c   :  { %v110_v20 = vpop.permute.xlu1 %109 }
  0x8d   :  { %v105_v37 = vpop.permute.xlu0 %104  ;;  %v266_v38 = vsel %vm264_vm1, %v236_v25, %v259_v34  ;;  %v126_v43 = vmul.f32 %v110_v20, %v80_v33  ;;  %v125_v51 = vmul.f32 %v110_v20, %v75_v36 }
  0x8e   :  { %278 = vst [vmem:[#allocation2 + $0x8] sm:$0x77] %v266_v38  ;;  %v123_v17 = vmul.f32 %v105_v37, %v75_v36  ;;  %v124_v39 = vmul.f32 %v105_v37, %v80_v33 }
  0x90   :  { %v241_v44 = vadd.f32 %v215_v42, %v124_v39  ;;  %v220_v45 = vld.sshfl [vmem:[#allocation1 + $0x10] sm:$0xff pattern:$0x75316420]  ;;  %v221_v46 = vld.sshfl [vmem:[#allocation1 + $0x18] sm:$0xff pattern:$0x75316420]  ;;  %v240_v53 = vadd.f32 %v214_v41, %v123_v17 }
  0x91   :  { %v217_v48 = vld.sshfl [vmem:[#allocation1] sm:$0xff pattern:$0x75316420]  ;;  %v218_v49 = vld.sshfl [vmem:[#allocation1 + $0x8] sm:$0xff pattern:$0x75316420]  ;;  %v245_v50 = vadd.f32 %v221_v46, %v128_v40  ;;  %v244_v55 = vadd.f32 %v220_v45, %v127_v47 }
  0x92   :  { %v243_v52 = vadd.f32 %v218_v49, %v126_v43  ;;  %v261_v54 = vrot.slane %v241_v44, 4  ;;  %v242_v57 = vadd.f32 %v217_v48, %v125_v51 }
  0x93   :  { %v263_v56 = vrot.slane %v245_v50, 4 }
  0x94   :  { %v262_v58 = vrot.slane %v243_v52, 4  ;;  %v268_v59 = vsel %vm264_vm1, %v240_v53, %v261_v54 }
  0x95   :  { %280 = vst [vmem:[#allocation2 + $0x18] sm:$0x77] %v268_v59  ;;  %v270_v60 = vsel %vm264_vm1, %v244_v55, %v263_v56 }
  0x96   :  { %v269_v61 = vsel %vm264_vm1, %v242_v57, %v262_v58  ;;  %282 = vst [vmem:[#allocation2 + $0x28] sm:$0x77] %v270_v60 }
  0x97   :  { %281 = vst [vmem:[#allocation2 + $0x20] sm:$0x77] %v269_v61 }
  0x98   :  { %295 = dma.vmem_to_hbm [thread:$0]  %s288_s19, 768, %s290_s22, [#allocation3], %s338_s3, %s338_s3, %s339_s23  }
  0x99   :  { %333 = dma.done.wait [#allocation3], 768  }
  0x9a   :  { %334 = vsyncadd [#allocation3], 4294966528 }
  0x9b   :  { %300 = vsyncpa [#allocation3], 1 }

</bundles_post_ra>
